<compile_context>
chip_gen: v7x
topology: tpu7x:2x2x1
jax: 0.10.0
libtpu: 0.0.40
codegen_flags: <defaults>
</compile_context>

<pallas_src>
import functools

import jax
import jax.numpy as jnp
from jax import lax
from jax.experimental import pallas as pl
from jax.experimental.pallas import tpu as pltpu


def _cdiv(a, b):
    return -(-a // b)


def _round_up(v, m):
    return _cdiv(v, m) * m


# ---------------------------------------------------------------------------
# Kernel
# ---------------------------------------------------------------------------
def dueling_q_kernel(x_ref, w1_ref, b1_ref, w2_ref, b2_ref,
                     wva1_ref, bva1_ref, whead_ref, bhead_ref,
                     q_ref, *, action_dim, value_col):
    """One batch tile [TM, obs] (bf16) -> lane-dense dueling Q tile [TM, OUT_PAD] (bf16)."""
    f32 = jnp.float32
    bf16 = jnp.bfloat16

    # feature_network: Linear(obs, 64->padded 128) -> ReLU -> Linear(128, 128) -> ReLU
    x = x_ref[...]                                                   # bf16 already
    h1 = jnp.dot(x, w1_ref[...], preferred_element_type=f32) + b1_ref[...]
    h1 = jnp.maximum(h1, 0.0)
    feat = jnp.dot(h1.astype(bf16), w2_ref[...], preferred_element_type=f32) + b2_ref[...]
    feat = jnp.maximum(feat, 0.0)

    # Fused value|advantage first layers: one [128, 256] matmul.
    #   hva[:, 0:128]   == value-stream hidden
    #   hva[:, 128:256] == advantage-stream hidden
    hva = jnp.dot(feat.astype(bf16), wva1_ref[...], preferred_element_type=f32) + bva1_ref[...]
    hva = jnp.maximum(hva, 0.0)

    # Fused heads: block-diagonal [256, OUT_PAD] weight.
    #   cols [0, action_dim)  <- advantage head (driven by hva[:, 128:256])
    #   col  value_col        <- value head     (driven by hva[:, 0:128])
    #   all other cols        <- exactly zero (zero weights + zero bias)
    va = jnp.dot(hva.astype(bf16), whead_ref[...], preferred_element_type=f32) + bhead_ref[...]

    col = lax.broadcasted_iota(jnp.int32, va.shape, 1)
    adv_mask = col < action_dim
    # Padded advantage columns are exactly zero, so the masked sum is the true
    # sum over the real action_dim columns (the mask only has to exclude the
    # value column + padding when summing).
    a_mean = jnp.sum(jnp.where(adv_mask, va, 0.0), axis=1, keepdims=True) * (1.0 / action_dim)
    v = va[:, value_col:value_col + 1]                               # [TM, 1]
    # No output mask: padded columns carry garbage but are sliced off on host.
    q_ref[...] = (va + (v - a_mean)).astype(q_ref.dtype)


# ---------------------------------------------------------------------------
# Wrapper
# ---------------------------------------------------------------------------
def _choose_tiling(batch, max_tile=2048):
    """Return (tile_m, n_blocks): tile_m % 8 == 0, n_blocks even (>=2) when possible."""
    b8 = _round_up(max(batch, 1), 8)
    if b8 <= 8:
        return 8, 1                              # tiny inference call: one 8-row tile
    n_blocks = max(2, _cdiv(b8, max_tile))
    if n_blocks % 2:
        n_blocks += 1                            # even split -> both v7x TCs balanced
    tile_m = _round_up(_cdiv(b8, n_blocks), 8)
    return tile_m, n_blocks


def dueling_q_forward(x, packed, max_tile=2048):
    """x: [B, observation_dim] (or [observation_dim]) f32/bf16.  packed: pack_params() output."""
    if x.ndim == 1:
        x = x[None, :]
    B, obs_dim = x.shape
    action_dim = packed["action_dim"]
    out_pad = packed["w_head"].shape[1]
    value_col = out_pad - 1

    tile_m, n_blocks = _choose_tiling(B, max_tile)
    b_padded = tile_m * n_blocks

    x = x.astype(jnp.bfloat16)                   # halve streamed input DMA
    if b_padded != B:
        x = jnp.pad(x, ((0, b_padded - B), (0, 0)))

    weights = (packed["w1"], packed["b1"], packed["w2"], packed["b2"],
               packed["w_va1"], packed["b_va1"], packed["w_head"], packed["b_head"])

    # Weights/biases: constant index_map -> resident in VMEM across the grid.
    resident = lambda arr: pl.BlockSpec(arr.shape, lambda i: (0, 0))
    in_specs = ([pl.BlockSpec((tile_m, obs_dim), lambda i: (i, 0))]
                + [resident(w) for w in weights])
    out_specs = pl.BlockSpec((tile_m, out_pad), lambda i: (i, 0))

    flops = 2 * b_padded * (obs_dim * 128 + 128 * 128 + 128 * 256 + 256 * out_pad)
    bytes_accessed = (int(x.size) * 2
                      + sum(int(w.size) * w.dtype.itemsize for w in weights)
                      + b_padded * out_pad * 2)

    q_padded = pl.pallas_call(
        functools.partial(dueling_q_kernel,
                          action_dim=action_dim, value_col=value_col),
        out_shape=jax.ShapeDtypeStruct((b_padded, out_pad), jnp.bfloat16),
        grid=(n_blocks,),
        in_specs=in_specs,
        out_specs=out_specs,
        compiler_params=pltpu.CompilerParams(
            dimension_semantics=("parallel",),       # batch axis -> v7x 2 TCs
            vmem_limit_bytes=32 * 1024 * 1024),
        cost_estimate=pl.CostEstimate(flops=flops, transcendentals=0,
                                      bytes_accessed=bytes_accessed),
    )(x, *weights)
    # TODO(synk): greedyAction / Q_value consumers could read the padded bf16
    # buffer (or fuse argmax/gather in-kernel) to skip this strided slice.
    return q_padded[:B, :action_dim].astype(jnp.float32)


# ---------------------------------------------------------------------------
# Parameter construction / packing
# ---------------------------------------------------------------------------
def init_params(key, observation_dim, action_dim):
    """PyTorch-style Linear init, weights stored pre-transposed as [in, out]."""
    def linear(k, fan_in, fan_out):
        kw, kb = jax.random.split(k)
        bound = 1.0 / jnp.sqrt(fan_in)
        w = jax.random.uniform(kw, (fan_in, fan_out), jnp.float32, -bound, bound)
        b = jax.random.uniform(kb, (1, fan_out), jnp.float32, -bound, bound)
        return w, b

    keys = jax.random.split(key, 6)
    w1, b1 = linear(keys[0], observation_dim, 64)
    w2, b2 = linear(keys[1], 64, 128)
    wv1, bv1 = linear(keys[2], 128, 128)
    wv2, bv2 = linear(keys[3], 128, 1)
    wa1, ba1 = linear(keys[4], 128, 128)
    wa2, ba2 = linear(keys[5], 128, action_dim)
    return dict(w1=w1, b1=b1, w2=w2, b2=b2,
                wv1=wv1, bv1=bv1, wv2=wv2, bv2=bv2,
                wa1=wa1, ba1=ba1, wa2=wa2, ba2=ba2)


def pack_params(p, action_dim):
    """Fuse/pad the per-layer params into the kernel's bf16 weight layout."""
    assert action_dim >= 1
    out_pad = max(128, _round_up(action_dim + 1, 128))           # lane-dense output
    value_col = out_pad - 1

    # Lane-dense first hidden layer: 64 -> 128 with zero-padded cols/rows.
    obs_dim = p["w1"].shape[0]
    w1 = jnp.zeros((obs_dim, 128), jnp.float32).at[:, :64].set(p["w1"])
    b1 = jnp.zeros((1, 128), jnp.float32).at[:, :64].set(p["b1"])
    w2 = jnp.zeros((128, 128), jnp.float32).at[:64, :].set(p["w2"])

    w_va1 = jnp.concatenate([p["wv1"], p["wa1"]], axis=1)        # [128, 256]
    b_va1 = jnp.concatenate([p["bv1"], p["ba1"]], axis=1)        # [1, 256]

    w_head = jnp.zeros((256, out_pad), jnp.float32)
    w_head = w_head.at[0:128, value_col:value_col + 1].set(p["wv2"])   # value
    w_head = w_head.at[128:256, 0:action_dim].set(p["wa2"])            # advantage
    b_head = jnp.zeros((1, out_pad), jnp.float32)
    b_head = b_head.at[0, value_col].set(p["bv2"][0, 0])
    b_head = b_head.at[0, 0:action_dim].set(p["ba2"][0])

    # The in-kernel masked advantage mean relies on these padded columns being
    # exactly zero; guard against future edits that would silently bias it.
    assert bool(jnp.all(w_head[:, action_dim:value_col] == 0.0))
    assert bool(jnp.all(b_head[:, action_dim:value_col] == 0.0))

    bf16 = jnp.bfloat16
    return dict(
        w1=w1.astype(bf16), b1=b1,
        w2=w2.astype(bf16), b2=p["b2"],
        w_va1=w_va1.astype(bf16), b_va1=b_va1,
        w_head=w_head.astype(bf16), b_head=b_head,
        action_dim=int(action_dim),
    )


# ---------------------------------------------------------------------------
# References (for correctness checking only)
# ---------------------------------------------------------------------------
def reference_forward(x, p, emulate_bf16=True):
    """Unfused reference.  With emulate_bf16=True it applies the same bf16
    rounding to matmul inputs as the kernel (f32 accumulation)."""
    cast = (lambda z: z.astype(jnp.bfloat16)) if emulate_bf16 else (lambda z: z)
    dot = lambda a, b: jnp.dot(cast(a), cast(b), preferred_element_type=jnp.float32)
    relu = lambda z: jnp.maximum(z, 0.0)
    h = relu(dot(x, p["w1"]) + p["b1"])
    feat = relu(dot(h, p["w2"]) + p["b2"])
    v = dot(relu(dot(feat, p["wv1"]) + p["bv1"]), p["wv2"]) + p["bv2"]
    a = dot(relu(dot(feat, p["wa1"]) + p["ba1"]), p["wa2"]) + p["ba2"]
    return v + (a - jnp.mean(a, axis=1, keepdims=True))


# TODO(synk): the Adam optimizer / SmoothL1 fit(), Q_value gather, maxQ and
# greedyAction are host-side training/selection utilities, not part of the
# forward pass; they are intentionally not implemented as kernels.

if __name__ == "__main__":
    observation_dim = 16
    action_dim = 8

    key = jax.random.PRNGKey(0)
    k_params, k_x1, k_x2 = jax.random.split(key, 3)
    base_params = init_params(k_params, observation_dim, action_dim)
    packed_params = pack_params(base_params, action_dim)

    # Small inference-sized batch: single 8-row tile (no more padding to 256).
    x_small = jax.random.normal(k_x1, (2, observation_dim), jnp.float32)
    q_small = dueling_q_forward(x_small, packed_params)
    jax.block_until_ready(q_small)
    assert q_small.shape == (2, action_dim)

    # A batch that exercises the multi-block (two grid steps / megacore) path.
    x_big = jax.random.normal(k_x2, (48, observation_dim), jnp.float32)
    q_big = dueling_q_forward(x_big, packed_params)
    jax.block_until_ready(q_big)
    assert q_big.shape == (48, action_dim)

    for xin, q in ((x_small, q_small), (x_big, q_big)):
        # Tight check vs a bf16-input / f32-accumulate reference rounded to the
        # kernel's bf16 output precision.
        q_ref = reference_forward(xin, base_params, emulate_bf16=True)
        q_ref_b = q_ref.astype(jnp.bfloat16).astype(jnp.float32)
        assert jnp.allclose(q, q_ref_b, atol=2e-2, rtol=2e-2), "mismatch vs bf16 reference"
        # Loose sanity check vs pure-f32 math (bf16 weights/output are a precision tradeoff).
        q_ref32 = reference_forward(xin, base_params, emulate_bf16=False)
        assert jnp.allclose(q, q_ref32, atol=1e-1, rtol=1e-1), "mismatch vs f32 reference"

    print("KERNEL_OK")
</pallas_src>

<mosaic_0001>
module attributes {stable_mosaic.version = 11 : i64} {
  func.func @dueling_q_kernel(%arg0: i32, %arg1: memref<8x16xbf16, #tpu.memory_space<vmem>>, %arg2: memref<16x128xbf16, #tpu.memory_space<vmem>>, %arg3: memref<1x128xf32, #tpu.memory_space<vmem>>, %arg4: memref<128x128xbf16, #tpu.memory_space<vmem>>, %arg5: memref<1x128xf32, #tpu.memory_space<vmem>>, %arg6: memref<128x256xbf16, #tpu.memory_space<vmem>>, %arg7: memref<1x256xf32, #tpu.memory_space<vmem>>, %arg8: memref<256x128xbf16, #tpu.memory_space<vmem>>, %arg9: memref<1x128xf32, #tpu.memory_space<vmem>>, %arg10: memref<8x128xbf16, #tpu.memory_space<vmem>>) attributes {dimension_semantics = [#tpu.dimension_semantics<parallel>], iteration_bounds = array<i64: 1>, scalar_prefetch = 0 : i64, scratch_operands = 0 : i64, tpu.core_type = #tpu.core_type<tc>, window_params = [{transform_indices = @transform_0, window_bounds = array<i64: 8, 16>}, {pipeline_mode = #tpu.pipeline_mode<synchronous>, transform_indices = @transform_1, window_bounds = array<i64: 16, 128>}, {pipeline_mode = #tpu.pipeline_mode<synchronous>, transform_indices = @transform_2, window_bounds = array<i64: 1, 128>}, {pipeline_mode = #tpu.pipeline_mode<synchronous>, transform_indices = @transform_3, window_bounds = array<i64: 128, 128>}, {pipeline_mode = #tpu.pipeline_mode<synchronous>, transform_indices = @transform_4, window_bounds = array<i64: 1, 128>}, {pipeline_mode = #tpu.pipeline_mode<synchronous>, transform_indices = @transform_5, window_bounds = array<i64: 128, 256>}, {pipeline_mode = #tpu.pipeline_mode<synchronous>, transform_indices = @transform_6, window_bounds = array<i64: 1, 256>}, {pipeline_mode = #tpu.pipeline_mode<synchronous>, transform_indices = @transform_7, window_bounds = array<i64: 256, 128>}, {pipeline_mode = #tpu.pipeline_mode<synchronous>, transform_indices = @transform_8, window_bounds = array<i64: 1, 128>}, {transform_indices = @transform_9, window_bounds = array<i64: 8, 128>}]} {
    %c0 = arith.constant 0 : index
    %c0_0 = arith.constant 0 : index
    %0 = vector.load %arg1[%c0, %c0_0] : memref<8x16xbf16, #tpu.memory_space<vmem>>, vector<8x16xbf16>
    %c0_1 = arith.constant 0 : index
    %c0_2 = arith.constant 0 : index
    %1 = vector.load %arg2[%c0_1, %c0_2] : memref<16x128xbf16, #tpu.memory_space<vmem>>, vector<16x128xbf16>
    %cst = arith.constant dense<0.000000e+00> : vector<8x128xf32>
    %2 = tpu.matmul %0, %1, %cst {dimension_numbers = #tpu.dot_dimension_numbers<[1], [0], [0], [1], [0, 0, 1, 1], [], []>} : vector<8x16xbf16>, vector<16x128xbf16>, vector<8x128xf32> -> vector<8x128xf32>
    %c0_3 = arith.constant 0 : index
    %c0_4 = arith.constant 0 : index
    %3 = vector.load %arg3[%c0_3, %c0_4] : memref<1x128xf32, #tpu.memory_space<vmem>>, vector<1x128xf32>
    %4 = vector.broadcast %3 : vector<1x128xf32> to vector<8x128xf32>
    %5 = arith.addf %2, %4 : vector<8x128xf32>
    %cst_5 = arith.constant 0.000000e+00 : f32
    %6 = vector.broadcast %cst_5 : f32 to vector<8x128xf32>
    %7 = arith.maximumf %5, %6 : vector<8x128xf32>
    %8 = arith.truncf %7 : vector<8x128xf32> to vector<8x128xbf16>
    %c0_6 = arith.constant 0 : index
    %c0_7 = arith.constant 0 : index
    %9 = vector.load %arg4[%c0_6, %c0_7] : memref<128x128xbf16, #tpu.memory_space<vmem>>, vector<128x128xbf16>
    %cst_8 = arith.constant dense<0.000000e+00> : vector<8x128xf32>
    %10 = tpu.matmul %8, %9, %cst_8 {dimension_numbers = #tpu.dot_dimension_numbers<[1], [0], [0], [1], [0, 0, 1, 1], [], []>} : vector<8x128xbf16>, vector<128x128xbf16>, vector<8x128xf32> -> vector<8x128xf32>
    %c0_9 = arith.constant 0 : index
    %c0_10 = arith.constant 0 : index
    %11 = vector.load %arg5[%c0_9, %c0_10] : memref<1x128xf32, #tpu.memory_space<vmem>>, vector<1x128xf32>
    %12 = vector.broadcast %11 : vector<1x128xf32> to vector<8x128xf32>
    %13 = arith.addf %10, %12 : vector<8x128xf32>
    %cst_11 = arith.constant 0.000000e+00 : f32
    %14 = vector.broadcast %cst_11 : f32 to vector<8x128xf32>
    %15 = arith.maximumf %13, %14 : vector<8x128xf32>
    %16 = arith.truncf %15 : vector<8x128xf32> to vector<8x128xbf16>
    %c0_12 = arith.constant 0 : index
    %c0_13 = arith.constant 0 : index
    %17 = vector.load %arg6[%c0_12, %c0_13] : memref<128x256xbf16, #tpu.memory_space<vmem>>, vector<128x256xbf16>
    %cst_14 = arith.constant dense<0.000000e+00> : vector<8x256xf32>
    %18 = tpu.matmul %16, %17, %cst_14 {dimension_numbers = #tpu.dot_dimension_numbers<[1], [0], [0], [1], [0, 0, 1, 1], [], []>} : vector<8x128xbf16>, vector<128x256xbf16>, vector<8x256xf32> -> vector<8x256xf32>
    %c0_15 = arith.constant 0 : index
    %c0_16 = arith.constant 0 : index
    %19 = vector.load %arg7[%c0_15, %c0_16] : memref<1x256xf32, #tpu.memory_space<vmem>>, vector<1x256xf32>
    %20 = vector.broadcast %19 : vector<1x256xf32> to vector<8x256xf32>
    %21 = arith.addf %18, %20 : vector<8x256xf32>
    %cst_17 = arith.constant 0.000000e+00 : f32
    %22 = vector.broadcast %cst_17 : f32 to vector<8x256xf32>
    %23 = arith.maximumf %21, %22 : vector<8x256xf32>
    %24 = arith.truncf %23 : vector<8x256xf32> to vector<8x256xbf16>
    %c0_18 = arith.constant 0 : index
    %c0_19 = arith.constant 0 : index
    %25 = vector.load %arg8[%c0_18, %c0_19] : memref<256x128xbf16, #tpu.memory_space<vmem>>, vector<256x128xbf16>
    %cst_20 = arith.constant dense<0.000000e+00> : vector<8x128xf32>
    %26 = tpu.matmul %24, %25, %cst_20 {dimension_numbers = #tpu.dot_dimension_numbers<[1], [0], [0], [1], [0, 0, 1, 1], [], []>} : vector<8x256xbf16>, vector<256x128xbf16>, vector<8x128xf32> -> vector<8x128xf32>
    %c0_21 = arith.constant 0 : index
    %c0_22 = arith.constant 0 : index
    %27 = vector.load %arg9[%c0_21, %c0_22] : memref<1x128xf32, #tpu.memory_space<vmem>>, vector<1x128xf32>
    %28 = vector.broadcast %27 : vector<1x128xf32> to vector<8x128xf32>
    %29 = arith.addf %26, %28 : vector<8x128xf32>
    %30 = tpu.iota {dimensions = array<i32: 1>} : vector<8x128xi32>
    %c8_i32 = arith.constant 8 : i32
    %31 = vector.broadcast %c8_i32 : i32 to vector<8x128xi32>
    %32 = arith.cmpi slt, %30, %31 : vector<8x128xi32>
    %cst_23 = arith.constant 0.000000e+00 : f32
    %33 = vector.broadcast %cst_23 : f32 to vector<8x128xf32>
    %34 = arith.select %32, %29, %33 : vector<8x128xi1>, vector<8x128xf32>
    %cst_24 = arith.constant dense<0.000000e+00> : vector<8xf32>
    %35 = vector.multi_reduction <add>, %34, %cst_24 [1] : vector<8x128xf32> to vector<8xf32>
    %36 = vector.shape_cast %35 : vector<8xf32> to vector<8x1xf32>
    %cst_25 = arith.constant 1.250000e-01 : f32
    %37 = vector.broadcast %cst_25 : f32 to vector<8x1xf32>
    %38 = arith.mulf %36, %37 : vector<8x1xf32>
    %39 = vector.extract_strided_slice %29 {offsets = [0, 127], sizes = [8, 1], strides = [1, 1]} : vector<8x128xf32> to vector<8x1xf32>
    %40 = arith.subf %39, %38 : vector<8x1xf32>
    %41 = vector.broadcast %40 : vector<8x1xf32> to vector<8x128xf32>
    %42 = arith.addf %29, %41 : vector<8x128xf32>
    %43 = arith.truncf %42 : vector<8x128xf32> to vector<8x128xbf16>
    %c0_26 = arith.constant 0 : index
    %c0_27 = arith.constant 0 : index
    %44 = vector.load %arg10[%c0_26, %c0_27] : memref<8x128xbf16, #tpu.memory_space<vmem>>, vector<8x128xbf16>
    tpu.vector_store %arg10[%c0_26, %c0_27], %43 {strides = array<i32>} : memref<8x128xbf16, #tpu.memory_space<vmem>>, vector<8x128xbf16>,
    return
  }
  func.func @transform_0(%arg0: i32) -> (i32, i32) {
    %c0_i32 = arith.constant 0 : i32
    %c0_i32_0 = arith.constant 0 : i32
    return %arg0, %c0_i32 : i32, i32
  }
  func.func @transform_1(%arg0: i32) -> (i32, i32) {
    %c0_i32 = arith.constant 0 : i32
    %c0_i32_0 = arith.constant 0 : i32
    %c0_i32_1 = arith.constant 0 : i32
    return %c0_i32, %c0_i32_0 : i32, i32
  }
  func.func @transform_2(%arg0: i32) -> (i32, i32) {
    %c0_i32 = arith.constant 0 : i32
    %c0_i32_0 = arith.constant 0 : i32
    %c0_i32_1 = arith.constant 0 : i32
    return %c0_i32, %c0_i32_0 : i32, i32
  }
  func.func @transform_3(%arg0: i32) -> (i32, i32) {
    %c0_i32 = arith.constant 0 : i32
    %c0_i32_0 = arith.constant 0 : i32
    %c0_i32_1 = arith.constant 0 : i32
    return %c0_i32, %c0_i32_0 : i32, i32
  }
  func.func @transform_4(%arg0: i32) -> (i32, i32) {
    %c0_i32 = arith.constant 0 : i32
    %c0_i32_0 = arith.constant 0 : i32
    %c0_i32_1 = arith.constant 0 : i32
    return %c0_i32, %c0_i32_0 : i32, i32
  }
  func.func @transform_5(%arg0: i32) -> (i32, i32) {
    %c0_i32 = arith.constant 0 : i32
    %c0_i32_0 = arith.constant 0 : i32
    %c0_i32_1 = arith.constant 0 : i32
    return %c0_i32, %c0_i32_0 : i32, i32
  }
  func.func @transform_6(%arg0: i32) -> (i32, i32) {
    %c0_i32 = arith.constant 0 : i32
    %c0_i32_0 = arith.constant 0 : i32
    %c0_i32_1 = arith.constant 0 : i32
    return %c0_i32, %c0_i32_0 : i32, i32
  }
  func.func @transform_7(%arg0: i32) -> (i32, i32) {
    %c0_i32 = arith.constant 0 : i32
    %c0_i32_0 = arith.constant 0 : i32
    %c0_i32_1 = arith.constant 0 : i32
    return %c0_i32, %c0_i32_0 : i32, i32
  }
  func.func @transform_8(%arg0: i32) -> (i32, i32) {
    %c0_i32 = arith.constant 0 : i32
    %c0_i32_0 = arith.constant 0 : i32
    %c0_i32_1 = arith.constant 0 : i32
    return %c0_i32, %c0_i32_0 : i32, i32
  }
  func.func @transform_9(%arg0: i32) -> (i32, i32) {
    %c0_i32 = arith.constant 0 : i32
    %c0_i32_0 = arith.constant 0 : i32
    return %arg0, %c0_i32 : i32, i32
  }
}

</mosaic_0001>

<bundles_post_ra>
// kernel: tpu_custom_call.1
= control target key start
LH: loop header
LB: loop body
LE: loop exit
PB: predicated region body
PF: predicated region fallthrough
CT: control target
= control target key end

     0   :  { %14 = vsyncpa [#allocation3], 0  ;;  %s1108_s0 = inlined_call_operand.hbm [shape: bf16[8,16], index: 0, kind: input, shape index: {}]   ;;  %s1109_s1 = inlined_call_operand.hbm [shape: bf16[16,128], index: 1, kind: input, shape index: {}]   ;;  %s1110_s2 = inlined_call_operand.vmem [shape: f32[1,128], index: 2, kind: input, shape index: {}]   ;;  %s1111_s3 = inlined_call_operand.hbm [shape: bf16[128,128], index: 3, kind: input, shape index: {}]   ;;  %s1112_s4 = inlined_call_operand.vmem [shape: f32[1,128], index: 4, kind: input, shape index: {}]   ;;  %s1113_s5 = inlined_call_operand.hbm [shape: bf16[128,256], index: 5, kind: input, shape index: {}]   ;;  %s1114_s6 = inlined_call_operand.vmem [shape: f32[1,256], index: 6, kind: input, shape index: {}]   ;;  %s1115_s7 = inlined_call_operand.hbm [shape: bf16[256,128], index: 7, kind: input, shape index: {}]   ;;  %s1116_s8 = inlined_call_operand.vmem [shape: f32[1,128], index: 8, kind: input, shape index: {}]   ;;  %s1117_s9 = inlined_call_operand.hbm [shape: bf16[8,128], index: 9, kind: output, shape index: {}]  }
   0x1   :  { %15 = vsyncpa [#allocation6], 0 }
   0x2   :  { %16 = vsyncpa [#allocation9], 0 }
   0x3   :  { %17 = vsyncpa [#allocation4], 0  ;;  %s944_s30 = smov [#allocation5]   ;;  %s804_s13 = scalar_lea.hbm %s1109_s1, 128 }
   0x4   :  { %s33_s10 = sshll.u32 %s944_s30, 4  ;;  %p805_p0 = scmp.ne.s32.totalorder %s1109_s1, %s804_s13  ;;  %s34_s10 = int_to_ptr.vmem [resolvable:$true] %s33_s10 }
   0x5   :  { %p808_p1 = scmp.lt.u32.totalorder %s804_s13, %s1109_s1 }
   0x7   :  { %p810_p2 = pnand %p808_p1, %p805_p0 }
   0x9   :  { %813 = shalt.err (!%p810_p2)
}
   0xa   :  { %s814_s18 = scalar_lea.vmem %s34_s10, 128  ;;  %p819_p4 = scmp.lt.s32.totalorder %s34_s10, %s34_s10 }
   0xb   :  { %p815_p3 = scmp.ne.s32.totalorder %s34_s10, %s814_s18  ;;  %p820_p5 = scmp.lt.s32.totalorder %s814_s18, %s814_s18 }
   0xd   :  { %p821_p6 = por %p820_p5, %p819_p4 }
   0xf   :  { %p822_p7 = pnand %p821_p6, %p815_p3 }
  0x11   :  { %825 = shalt.err (!%p822_p7)
}
  0x12   :  { %s945_s19 = smov 64   ;;  %s946_s20 = smov 4  }
  0x13   :  { %39 = dma.hbm_to_vmem [thread:$0]  %s1109_s1, 128, %s34_s10, [#allocation6], %s945_s19, %s945_s19, %s946_s20  }
  0x14   :  { %s947_s23 = smov [#allocation8]   ;;  %s826_s27 = scalar_lea.hbm %s1113_s5, 2048 }
  0x15   :  { %s61_s24 = sshll.u32 %s947_s23, 4  ;;  %p827_p8 = scmp.ne.s32.totalorder %s1113_s5, %s826_s27  ;;  %s62_s24 = int_to_ptr.vmem [resolvable:$true] %s61_s24 }
  0x16   :  { %p830_p9 = scmp.lt.u32.totalorder %s826_s27, %s1113_s5 }
  0x18   :  { %p832_p10 = pnand %p830_p9, %p827_p8 }
  0x1a   :  { %835 = shalt.err (!%p832_p10)
}
  0x1b   :  { %s836_s12 = scalar_lea.vmem %s62_s24, 2048  ;;  %p841_p12 = scmp.lt.s32.totalorder %s62_s24, %s62_s24 }
  0x1c   :  { %p837_p11 = scmp.ne.s32.totalorder %s62_s24, %s836_s12  ;;  %p842_p13 = scmp.lt.s32.totalorder %s836_s12, %s836_s12 }
  0x1e   :  { %p843_p0 = por %p842_p13, %p841_p12 }
  0x20   :  { %p844_p1 = pnand %p843_p0, %p837_p11 }
  0x22   :  { %847 = shalt.err (!%p844_p1)
}
  0x23   :  { %s948_s1 = smov 128   ;;  %s949_s10 = smov 8  }
  0x24   :  { %67 = dma.hbm_to_vmem [thread:$0]  %s1113_s5, 2048, %s62_s24, [#allocation9], %s948_s1, %s948_s1, %s949_s10  }
  0x25   :  { %s950_s15 = smov [#allocation2]   ;;  %s951_s17 = smov [#allocation7]  }
  0x26   :  { %s24_s16 = sshll.u32 %s950_s15, 4  ;;  %s47_s18 = sshll.u32 %s951_s17, 4  ;;  %s25_s16 = int_to_ptr.vmem [resolvable:$true] %s24_s16  ;;  %s1035_s18 = int_to_ptr.vmem [resolvable:$true] %s47_s18 }
  0x27   :  { %s848_s23 = scalar_lea.hbm %s1108_s0, 64 }
  0x28   :  { %p849_p2 = scmp.ne.s32.totalorder %s1108_s0, %s848_s23  ;;  %p852_p3 = scmp.lt.u32.totalorder %s848_s23, %s1108_s0 }
  0x2a   :  { %p854_p4 = pnand %p852_p3, %p849_p2 }
  0x2c   :  { %857 = shalt.err (!%p854_p4)
}
  0x2d   :  { %s858_s5 = scalar_lea.vmem %s25_s16, 64  ;;  %p863_p6 = scmp.lt.s32.totalorder %s25_s16, %s25_s16 }
  0x2e   :  { %p859_p5 = scmp.ne.s32.totalorder %s25_s16, %s858_s5  ;;  %p864_p7 = scmp.lt.s32.totalorder %s858_s5, %s858_s5 }
  0x30   :  { %p865_p8 = por %p864_p7, %p863_p6 }
  0x32   :  { %p866_p9 = pnand %p865_p8, %p859_p5 }
  0x34   :  { %869 = shalt.err (!%p866_p9)
}
  0x35   :  { %27 = dma.hbm_to_vmem [thread:$0]  %s1108_s0, 64, %s25_s16, [#allocation3]  }
  0x36   :  { %s870_s12 = scalar_lea.hbm %s1111_s3, 1024 }
  0x37   :  { %p871_p10 = scmp.ne.s32.totalorder %s1111_s3, %s870_s12  ;;  %p874_p11 = scmp.lt.u32.totalorder %s870_s12, %s1111_s3 }
  0x39   :  { %p876_p12 = pnand %p874_p11, %p871_p10 }
  0x3b   :  { %879 = shalt.err (!%p876_p12)
}
  0x3c   :  { %s880_s15 = scalar_lea.vmem %s1035_s18, 1024  ;;  %p885_p0 = scmp.lt.s32.totalorder %s1035_s18, %s1035_s18 }
  0x3d   :  { %p881_p13 = scmp.ne.s32.totalorder %s1035_s18, %s880_s15  ;;  %p886_p1 = scmp.lt.s32.totalorder %s880_s15, %s880_s15 }
  0x3f   :  { %p887_p2 = por %p886_p1, %p885_p0 }
  0x41   :  { %p888_p3 = pnand %p887_p2, %p881_p13 }
  0x43   :  { %891 = shalt.err (!%p888_p3)
}
  0x44   :  { %53 = dma.hbm_to_vmem [thread:$0]  %s1111_s3, 1024, %s1035_s18, [#allocation6], %s945_s19, %s945_s19, %s946_s20  }
  0x45   :  { %s952_s17 = smov [#allocation10]   ;;  %s892_s25 = scalar_lea.hbm %s1115_s7, 2048 }
  0x46   :  { %s75_s21 = sshll.u32 %s952_s17, 4  ;;  %p893_p4 = scmp.ne.s32.totalorder %s1115_s7, %s892_s25  ;;  %s76_s21 = int_to_ptr.vmem [resolvable:$true] %s75_s21 }
  0x47   :  { %p896_p5 = scmp.lt.u32.totalorder %s892_s25, %s1115_s7 }
  0x49   :  { %p898_p6 = pnand %p896_p5, %p893_p4 }
  0x4b   :  { %901 = shalt.err (!%p898_p6)
}
  0x4c   :  { %s902_s24 = scalar_lea.vmem %s76_s21, 2048  ;;  %p907_p8 = scmp.lt.s32.totalorder %s76_s21, %s76_s21 }
  0x4d   :  { %p903_p7 = scmp.ne.s32.totalorder %s76_s21, %s902_s24  ;;  %p908_p9 = scmp.lt.s32.totalorder %s902_s24, %s902_s24 }
  0x4f   :  { %p909_p10 = por %p908_p9, %p907_p8 }
  0x51   :  { %p910_p11 = pnand %p909_p10, %p903_p7 }
  0x53   :  { %913 = shalt.err (!%p910_p11)
}
  0x54   :  { %81 = dma.hbm_to_vmem [thread:$0]  %s1115_s7, 2048, %s76_s21, [#allocation9], %s945_s19, %s945_s19, %s946_s20  }
  0x55   :  { %936 = dma.done.wait [#allocation3], 64  }
  0x56   :  { %937 = vsyncadd [#allocation3], 4294967232 }
  0x57   :  { %938 = dma.done.wait [#allocation6], 1152  }
  0x58   :  { %939 = vsyncadd [#allocation6], 4294966144 }
  0x59   :  { %940 = dma.done.wait [#allocation9], 4096  }
  0x5a   :  { %941 = vsyncadd [#allocation9], 4294963200  ;;  %v953_v0 = vmov 0.0   ;;  %vm954_vm0 = vmmov 0   ;;  %v755_v1 = vld [vmem:[#allocation5] sm:$0xff]   ;;  %vm116_vm1 = vcmask 130048   ;;  %v293_v60 = vlaneseq }
  0x5b   :  { %714 = vmatprep.subr.bf16.mxu0 %v953_v0  ;;  %716 = vmatprep.mubr.msk.bf16.mxu0 %vm954_vm0, %v953_v0  ;;  %v100_v2 = vld [vmem:[#allocation2] sm:$0xf]  ;;  %v756_v3 = vld [vmem:[#allocation7] sm:$0xff]   ;;  %v757_v4 = vld [vmem:[#allocation7 + $0x8] sm:$0xff]   ;;  %v955_v35 = vmov 0  }
  0x5c   :  { %720 = vmatprep.subr.bf16.mxu1 %v953_v0  ;;  %736 = vmatprep.mubr.msk.bf16.mxu1 %vm954_vm0, %v953_v0  ;;  %v758_v5 = vld [vmem:[#allocation7 + $0x10] sm:$0xff]   ;;  %v759_v6 = vld [vmem:[#allocation7 + $0x18] sm:$0xff]   ;;  %v760_v7 = vld [vmem:[#allocation7 + $0x20] sm:$0xff]   ;;  %v294_v61 = vshrl.u32 %v293_v60, 7 }
  0x5d   :  { %715 = vmatpush3.bf16.msra.mxu0 %v755_v1  ;;  %721 = vmatpush3.bf16.msra.mxu1 %v756_v3  ;;  %v761_v8 = vld [vmem:[#allocation7 + $0x28] sm:$0xff]   ;;  %v762_v9 = vld [vmem:[#allocation7 + $0x30] sm:$0xff]   ;;  %v763_v10 = vld [vmem:[#allocation7 + $0x38] sm:$0xff]  }
  0x5e   :  { %722 = vmatprep.subr.bf16.mxu1 %v953_v0  ;;  %v764_v11 = vld [vmem:[#allocation8] ss:$8 sps:$4 sm:$0xff]   ;;  %v766_v12 = vld [vmem:[#allocation8 + $0x4] ss:$8 sps:$4 sm:$0xff]   ;;  %v769_v13 = vld [vmem:[#allocation8 + $0x14] ss:$8 sps:$4 sm:$0xff]  }
  0x5f   :  { %383 = vmatprep.subr.bf16.mxu0 %v766_v12  ;;  %v767_v14 = vld [vmem:[#allocation8 + $0x10] ss:$8 sps:$4 sm:$0xff]   ;;  %v772_v15 = vld [vmem:[#allocation8 + $0x24] ss:$8 sps:$4 sm:$0xff]   ;;  %v770_v16 = vld [vmem:[#allocation8 + $0x20] ss:$8 sps:$4 sm:$0xff]  }
  0x60   :  { %717 = vmatmul.mubr.msk.bf16.vlgmr.msra.gmra.mrb[0].mxu0 %vm116_vm1, %v100_v2  ;;  %v775_v17 = vld [vmem:[#allocation8 + $0x34] ss:$8 sps:$4 sm:$0xff]   ;;  %v773_v18 = vld [vmem:[#allocation8 + $0x30] ss:$8 sps:$4 sm:$0xff]   ;;  %v778_v19 = vld [vmem:[#allocation8 + $0x44] ss:$8 sps:$4 sm:$0xff]  }
  0x61   :  { %723 = vmatpush3.bf16.msra.mxu1 %v757_v4  ;;  %384 = vmatpush1.bf16.msra.mxu0 %v764_v11  ;;  %v776_v20 = vld [vmem:[#allocation8 + $0x40] ss:$8 sps:$4 sm:$0xff]   ;;  %v781_v21 = vld [vmem:[#allocation8 + $0x54] ss:$8 sps:$4 sm:$0xff]   ;;  %v779_v22 = vld [vmem:[#allocation8 + $0x50] ss:$8 sps:$4 sm:$0xff]  }
  0x62   :  { %724 = vmatprep.subr.bf16.mxu1 %v953_v0  ;;  %385 = vmatprep.subr.bf16.mxu0 %v769_v13  ;;  %v784_v23 = vld [vmem:[#allocation8 + $0x64] ss:$8 sps:$4 sm:$0xff]   ;;  %v782_v24 = vld [vmem:[#allocation8 + $0x60] ss:$8 sps:$4 sm:$0xff]   ;;  %v636_v25 = vld [vmem:[%s1110_s2] ss:$0 sm:$0xff] }
  0x63   :  { %v787_v33 = vld [vmem:[#allocation8 + $0x74] ss:$8 sps:$4 sm:$0xff]   ;;  %v785_v34 = vld [vmem:[#allocation8 + $0x70] ss:$8 sps:$4 sm:$0xff]   ;;  %415 = vmatprep.mubr.bf16.mxu0 %v955_v35  ;;  %v788_v36 = vld [vmem:[#allocation10 + $0x40] sm:$0xff]   ;;  %v295_v62 = vsub.s32 0, %v294_v61 }
  0x64   :  { %v789_v37 = vld [vmem:[#allocation10] sm:$0xff]   ;;  %v790_v38 = vld [vmem:[#allocation10 + $0x48] sm:$0xff]   ;;  %v792_v40 = vld [vmem:[#allocation10 + $0x50] sm:$0xff]   ;;  %v604_v13 = vand.u32 127, %v293_v60 }
  0x65   :  { %725 = vmatpush3.bf16.msra.mxu1 %v758_v5  ;;  %386 = vmatpush1.bf16.msra.mxu0 %v767_v14  ;;  %v791_v39 = vld [vmem:[#allocation10 + $0x8] sm:$0xff]   ;;  %v793_v41 = vld [vmem:[#allocation10 + $0x10] sm:$0xff]   ;;  %v794_v42 = vld [vmem:[#allocation10 + $0x58] sm:$0xff]  }
  0x66   :  { %726 = vmatprep.subr.bf16.mxu1 %v953_v0  ;;  %387 = vmatprep.subr.bf16.mxu0 %v772_v15  ;;  %v795_v43 = vld [vmem:[#allocation10 + $0x18] sm:$0xff]   ;;  %v796_v44 = vld [vmem:[#allocation10 + $0x60] sm:$0xff]   ;;  %v798_v46 = vld [vmem:[#allocation10 + $0x68] sm:$0xff]   ;;  %vm605_vm2 = vcmp.lt.s32.totalorder %v604_v13, 8 }
  0x67   :  { %v797_v45 = vld [vmem:[#allocation10 + $0x20] sm:$0xff]   ;;  %v799_v47 = vld [vmem:[#allocation10 + $0x28] sm:$0xff]   ;;  %v639_v48 = vld [vmem:[%s1112_s4] ss:$0 sm:$0xff] }
  0x68   :  { %v800_v56 = vld [vmem:[#allocation10 + $0x70] sm:$0xff]   ;;  %v802_v58 = vld [vmem:[#allocation10 + $0x78] sm:$0xff]  }
  0x69   :  { %727 = vmatpush3.bf16.msra.mxu1 %v759_v6  ;;  %388 = vmatpush1.bf16.msra.mxu0 %v770_v16  ;;  %v801_v57 = vld [vmem:[#allocation10 + $0x30] sm:$0xff]   ;;  %v803_v59 = vld [vmem:[#allocation10 + $0x38] sm:$0xff]  }
  0x6a   :  { %728 = vmatprep.subr.bf16.mxu1 %v953_v0  ;;  %389 = vmatprep.subr.bf16.mxu0 %v775_v17  ;;  %v291_v63 = vld [vmem:[%s1114_s6] sm:$0x3]  ;;  %s957_s6 = smov [#allocation11]  }
  0x6b   :  { %v296_v1 = vrot.slane %v291_v63, %v295_v62  ;;  %v664_v15 = vld [vmem:[%s1116_s8] ss:$0 sm:$0xff]  ;;  %s625_s12 = sshll.u32 %s957_s6, 4  ;;  %s626_s12 = int_to_ptr.vmem [resolvable:$true] %s625_s12 }
  0x6c   :  { %s914_s8 = scalar_lea.vmem %s626_s12, 64  ;;  %p919_p13 = scmp.lt.s32.totalorder %s626_s12, %s626_s12 }
  0x6d   :  { %729 = vmatpush3.bf16.msra.mxu1 %v760_v7  ;;  %390 = vmatpush1.bf16.msra.mxu0 %v773_v18  ;;  %p915_p12 = scmp.ne.s32.totalorder %s626_s12, %s914_s8  ;;  %p920_p0 = scmp.lt.s32.totalorder %s914_s8, %s914_s8 }
  0x6e   :  { %730 = vmatprep.subr.bf16.mxu1 %v953_v0  ;;  %391 = vmatprep.subr.bf16.mxu0 %v778_v19 }
  0x6f   :  { %p921_p1 = por %p920_p0, %p919_p13 }
  0x71   :  { %731 = vmatpush3.bf16.msra.mxu1 %v761_v8  ;;  %392 = vmatpush1.bf16.msra.mxu0 %v776_v20  ;;  %p922_p2 = pnand %p921_p1, %p915_p12 }
  0x72   :  { %732 = vmatprep.subr.bf16.mxu1 %v953_v0  ;;  %393 = vmatprep.subr.bf16.mxu0 %v781_v21 }
  0x75   :  { %733 = vmatpush3.bf16.msra.mxu1 %v762_v9  ;;  %394 = vmatpush1.bf16.msra.mxu0 %v779_v22  ;;  %v956_v22 = vmov 127  }
  0x76   :  { %734 = vmatprep.subr.bf16.mxu1 %v953_v0  ;;  %395 = vmatprep.subr.bf16.mxu0 %v784_v23  ;;  %v299_v0 = vsub.s32 1, %v294_v61 }
  0x77   :  { %754 = vset.pattern.permute.xlu0 %v956_v22 }
  0x78   :  { %v300_v2 = vrot.slane %v291_v63, %v299_v0 }
  0x79   :  { %735 = vmatpush3.bf16.msra.mxu1 %v763_v10  ;;  %396 = vmatpush1.bf16.msra.mxu0 %v782_v24 }
  0x7a   :  { %397 = vmatprep.subr.bf16.mxu0 %v787_v33  ;;  %692 = vmatprep.subr.bf16.mxu1 %v788_v36 }
  0x7d   :  { %398 = vmatpush1.bf16.msra.mxu0 %v785_v34 }
 0x133   :  { %v154_v26 = vpop.f32.mrb[0].mxu0 }
 0x134   :  { %v155_v27 = vadd.f32 %v636_v25, %v154_v26  ;;  %v718_v28 = vpop.f32.mrb[1].mxu0 }
 0x135   :  { %v157_v29 = vpop.f32.mrb[2].mxu0 }
 0x136   :  { %v160_v30 = vmax.f32 %v155_v27, 0.0  ;;  %v719_v31 = vpop.f32.mrb[3].mxu0 }
 0x138   :  { %v161_v32 = vpack.c.bf16 %v160_v30, %v160_v30 }
 0x13a   :  { %737 = vmatmul.mubr.bf16.vlgmr.msra.gmra.mrb[0].mxu1 %v161_v32 }
 0x13b   :  { %693 = vmatpush3.bf16.msra.mxu1 %v789_v37 }
 0x13c   :  { %694 = vmatprep.subr.bf16.mxu1 %v790_v38 }
 0x13f   :  { %695 = vmatpush3.bf16.msra.mxu1 %v791_v39 }
 0x140   :  { %696 = vmatprep.subr.bf16.mxu1 %v792_v40 }
 0x143   :  { %697 = vmatpush3.bf16.msra.mxu1 %v793_v41 }
 0x144   :  { %698 = vmatprep.subr.bf16.mxu1 %v794_v42 }
 0x147   :  { %699 = vmatpush3.bf16.msra.mxu1 %v795_v43 }
 0x148   :  { %700 = vmatprep.subr.bf16.mxu1 %v796_v44 }
 0x14b   :  { %701 = vmatpush3.bf16.msra.mxu1 %v797_v45 }
 0x14c   :  { %702 = vmatprep.subr.bf16.mxu1 %v798_v46 }
 0x14f   :  { %703 = vmatpush3.bf16.msra.mxu1 %v799_v47 }
 0x150   :  { %704 = vmatprep.subr.bf16.mxu1 %v800_v56 }
 0x153   :  { %705 = vmatpush3.bf16.msra.mxu1 %v801_v57 }
 0x154   :  { %706 = vmatprep.subr.bf16.mxu1 %v802_v58 }
 0x157   :  { %707 = vmatpush3.bf16.msra.mxu1 %v803_v59 }
 0x20d   :  { %v267_v49 = vpop.f32.mrb[0].mxu1 }
 0x20e   :  { %v268_v50 = vadd.f32 %v639_v48, %v267_v49  ;;  %v738_v51 = vpop.f32.mrb[1].mxu1 }
 0x20f   :  { %v270_v52 = vpop.f32.mrb[2].mxu1 }
 0x210   :  { %v273_v53 = vmax.f32 %v268_v50, 0.0  ;;  %v739_v54 = vpop.f32.mrb[3].mxu1 }
 0x212   :  { %v274_v55 = vpack.c.bf16 %v273_v53, %v273_v53 }
 0x214   :  { %416 = vmatmul.mubr.bf16.vlgmr.msra.gmra.mrb[4].mxu0 %v274_v55 }
 0x2e7   :  { %v417_v3 = vpop.f32.mrb[4].mxu0 }
 0x2e8   :  { %v418_v4 = vadd.f32 %v417_v3, %v296_v1  ;;  %v419_v5 = vpop.f32.mrb[5].mxu0 }
 0x2e9   :  { %v420_v6 = vadd.f32 %v419_v5, %v300_v2  ;;  %v421_v7 = vpop.f32.mrb[6].mxu0 }
 0x2ea   :  { %v424_v8 = vmax.f32 %v418_v4, 0.0  ;;  %v422_v9 = vpop.f32.mrb[7].mxu0 }
 0x2eb   :  { %v425_v10 = vmax.f32 %v420_v6, 0.0 }
 0x2ec   :  { %v426_v12 = vpack.c.bf16 %v424_v8, %v424_v8 }
 0x2ed   :  { %v427_v11 = vpack.c.bf16 %v425_v10, %v425_v10 }
 0x2ef   :  { %595 = vmatprep.mubr.bf16.mxu1 %v427_v11 }
 0x2f0   :  { %596 = vmatmul.mubr.bf16.vlgmr.msra.gmra.mrb[4].mxu1 %v426_v12 }
 0x3c3   :  { %v708_v14 = vpop.f32.mrb[4].mxu1 }
 0x3c4   :  { %v709_v16 = vpop.f32.mrb[5].mxu1 }
 0x3c5   :  { %v710_v17 = vadd.f32 %v709_v16, %v708_v14  ;;  %v711_v18 = vpop.f32.mrb[6].mxu1 }
 0x3c6   :  { %v712_v19 = vpop.f32.mrb[7].mxu1 }
 0x3c7   :  { %v598_v20 = vadd.f32 %v710_v17, %v664_v15 }
 0x3c9   :  { %v606_v21 = vsel %vm605_vm2, %v598_v20, 0.0 }
 0x3ca   :  { %607 = vadd.xlane.f32.xlu0 %v606_v21 }
 0x457   :  { %v608_v23 = vpop.xlane.xlu0 %607 }
 0x458   :  { %v609_v24 = vmul.f32 0.125, %v608_v23 }
 0x45a   :  { %v610_v25 = vsub.f32 %v598_v20, %v609_v24 }
 0x45c   :  { %613 = vperm.xlu0 %754, %v610_v25  }
 0x4db   :  { %v614_v26 = vpop.permute.xlu0 %613 }
 0x4dc   :  { %v616_v27 = vadd.f32 %v614_v26, %v598_v20 }
 0x4de   :  { %v617_v28 = vpack.c.bf16 %v616_v27, %v616_v27 }
 0x4e0   :  { %618 = vst [vmem:[#allocation11] sm:$0xf] %v617_v28 }
 0x4e1   :  { %925 = shalt.err (!%p922_p2)
}
 0x4e2   :  { %s926_s13 = scalar_lea.hbm %s1117_s9, 64 }
 0x4e3   :  { %p927_p3 = scmp.ne.s32.totalorder %s1117_s9, %s926_s13  ;;  %p930_p4 = scmp.lt.u32.totalorder %s926_s13, %s1117_s9 }
 0x4e5   :  { %p932_p5 = pnand %p930_p4, %p927_p3 }
 0x4e7   :  { %935 = shalt.err (!%p932_p5)
}
 0x4e8   :  { %628 = dma.vmem_to_hbm [thread:$0]  %s626_s12, 64, %s1117_s9, [#allocation4]  }
 0x4e9   :  { %942 = dma.done.wait [#allocation4], 64  }
 0x4ea   :  { %943 = vsyncadd [#allocation4], 4294967232 }
 0x4eb   :  { %632 = vsyncpa [#allocation3], 1 }
 0x4ec   :  { %633 = vsyncpa [#allocation6], 1 }
 0x4ed   :  { %634 = vsyncpa [#allocation9], 1 }
 0x4ee   :  { %635 = vsyncpa [#allocation4], 1 }

</bundles_post_ra>
